<compile_context>
chip_gen: v7x
topology: tpu7x:2x2x1
jax: 0.10.0
libtpu: 0.0.40
codegen_flags: <defaults>
</compile_context>

<pallas_src>
import functools
import math

import jax
import jax.numpy as jnp
from jax.experimental import pallas as pl
from jax.experimental.pallas import tpu as pltpu


def _round_up(x, m):
    return ((x + m - 1) // m) * m


def _make_mlp_max_kernel(num_layers):
    """Build a fused MLP+softmax kernel for a fixed number of Linear layers."""

    def kernel(x_ref, *refs):
        # refs = (w0, b0, w1, b1, ..., w_{L-1}, b_{L-1}, o_ref)
        o_ref = refs[-1]
        params = refs[:-1]

        h = x_ref[...]                                  # bf16 (bm, d_in)
        for l in range(num_layers):
            w = params[2 * l][...]                      # bf16 (K_l, N_l), lane-padded
            b = params[2 * l + 1][...]                  # f32  (1, N_l)
            # bf16 x bf16 -> f32 accumulate on the MXU.
            h = jnp.dot(h, w, preferred_element_type=jnp.float32) + b
            if l < num_layers - 1:                      # last layer: Identity
                # ReLU in f32, then back to bf16 for the next MXU pass.
                h = jnp.maximum(h, 0.0).astype(jnp.bfloat16)

        # Softmax over dim=1 (feature axis = last axis of the (bm, d_out) tile), f32.
        m = jnp.max(h, axis=-1, keepdims=True)
        e = jnp.exp(h - m)
        s = jnp.sum(e, axis=-1, keepdims=True)
        o_ref[...] = (e / s).astype(o_ref.dtype)        # exact divide: rows sum to 1

    return kernel


def prepare_params(weights, biases, *, lane=128):
    """One-time param prep: lane-pad hidden widths and cast matmul operands to bf16.

    weights[l]: (D_l, D_{l+1}) f32; biases[l]: (1, D_{l+1}) f32.
    Hidden output widths are zero-padded to multiples of 128 (zero W columns,
    zero biases, zero rows of the next layer's W), so padded units are exactly 0
    through bias + ReLU and the result is unchanged. The last layer keeps its
    exact output width so the kernel stores (B, d_out) directly.
    """
    weights = [jnp.asarray(w) for w in weights]
    biases = [jnp.asarray(b) for b in biases]
    num_layers = len(weights)

    padded_w, padded_b = [], []
    prev_out_pad = weights[0].shape[0]          # x's feature dim is not padded
    for l, (w, b) in enumerate(zip(weights, biases)):
        d_in_l, d_out_l = w.shape
        row_pad = prev_out_pad - d_in_l          # match previous (padded) width
        d_out_pad = d_out_l if l == num_layers - 1 else _round_up(d_out_l, lane)
        col_pad = d_out_pad - d_out_l
        w = jnp.pad(w, ((0, row_pad), (0, col_pad)))
        b = jnp.pad(b, ((0, 0), (0, col_pad)))
        padded_w.append(w.astype(jnp.bfloat16))  # bf16 MXU operand
        padded_b.append(b.astype(jnp.float32))   # bias added to f32 accumulator
        prev_out_pad = d_out_pad
    return tuple(padded_w), tuple(padded_b)


@functools.partial(jax.jit, static_argnames=("bm",))
def mlp_max_forward(x, weights, biases, *, bm=1024):
    """Fused MLP + softmax forward.

    x: (B, D_in) f32; weights/biases: output of prepare_params().
    Returns (B, D_out) probabilities (softmax over dim=1), f32.
    """
    B, d_in = x.shape
    num_layers = len(weights)
    d_out = weights[-1].shape[1]

    # Batch tiling: big tiles amortize the ~0.35 µs per-grid-step overhead, but
    # keep >=2 grid steps so ("parallel",) actually feeds both v7x TensorCores.
    bm = max(8, min(bm, _round_up(pl.cdiv(B, 2), 8)))
    grid = (pl.cdiv(B, bm),)

    # bf16 activations into the MXU; accumulation / softmax stay f32 in-kernel.
    x_bf16 = x.astype(jnp.bfloat16)

    in_specs = [pl.BlockSpec((bm, d_in), lambda i: (i, 0))]
    flat_params = []
    for w, b in zip(weights, biases):
        # Full-array blocks for parameters (grid-invariant, resident in VMEM).
        in_specs.append(pl.BlockSpec(w.shape, lambda i: (0, 0)))
        in_specs.append(pl.BlockSpec(b.shape, lambda i: (0, 0)))
        flat_params.extend([w, b])

    # Exact-width output block: last dim equals the full array dim, so the
    # (8,128) rule is satisfied; no wrapper-side slice / extra HBM round trip.
    out_spec = pl.BlockSpec((bm, d_out), lambda i: (i, 0))

    return pl.pallas_call(
        _make_mlp_max_kernel(num_layers),
        out_shape=jax.ShapeDtypeStruct((B, d_out), x.dtype),
        grid=grid,
        in_specs=in_specs,
        out_specs=out_spec,
        compiler_params=pltpu.CompilerParams(
            dimension_semantics=("parallel",),   # batch-parallel -> megacore on v7x
        ),
    )(x_bf16, *flat_params)


def init_params(key, n_neurons):
    """Deterministic init matching torch.nn.Linear's default U(-1/sqrt(fan_in), .)."""
    weights, biases = [], []
    for fan_in, fan_out in zip(n_neurons[:-1], n_neurons[1:]):
        key, kw, kb = jax.random.split(key, 3)
        bound = 1.0 / math.sqrt(fan_in)
        w = jax.random.uniform(kw, (fan_in, fan_out), jnp.float32, -bound, bound)
        b = jax.random.uniform(kb, (1, fan_out), jnp.float32, -bound, bound)
        weights.append(w)
        biases.append(b)
    return weights, biases


def mlp_max_reference(x, weights, biases):
    h = x
    n = len(weights)
    for l, (w, b) in enumerate(zip(weights, biases)):
        h = h @ w + b
        if l < n - 1:
            h = jnp.maximum(h, 0.0)
    return jax.nn.softmax(h, axis=1)


# TODO(synk): `sample()` (cumsum over d_out lanes + torch.rand categorical draw) is a
# host-side RNG utility on top of forward(); it could be fused into this kernel's
# epilogue with pltpu.prng_random_bits + an XLU cumsum to save a launch, but it is
# not part of the forward pass spec and is left out.

if __name__ == "__main__":
    # Small shapes consistent with the module: state (batch, n_neurons[0]).
    n_neurons = [32, 64, 48, 16]   # in_dim, hidden, hidden, n_actions
    batch = 512                    # -> bm=256, 2 grid steps (feeds both v7x TCs)

    key = jax.random.PRNGKey(0)
    key, kx = jax.random.split(key)
    x = jax.random.normal(kx, (batch, n_neurons[0]), jnp.float32)

    weights, biases = init_params(key, n_neurons)
    pw, pb = prepare_params(weights, biases)   # one-time: lane-pad + bf16 cast

    out = mlp_max_forward(x, pw, pb)
    out = jax.block_until_ready(out)

    ref = mlp_max_reference(x, weights, biases)
    assert out.shape == (batch, n_neurons[-1])
    # bf16 matmul operands (f32 accumulation) -> logits off by O(1e-3); softmax
    # probabilities match the f32 reference to well within 3e-2 absolute.
    assert float(jnp.max(jnp.abs(out - ref))) < 3e-2, "mismatch vs reference"
    # Exact divide -> each row sums to 1 to f32 rounding.
    assert jnp.allclose(jnp.sum(out, axis=1), 1.0, atol=1e-4)

    print("KERNEL_OK")
</pallas_src>

<mosaic_0001>
module attributes {stable_mosaic.version = 11 : i64} {
  func.func @kernel(%arg0: i32, %arg1: memref<256x32xbf16, #tpu.memory_space<vmem>>, %arg2: memref<32x128xbf16, #tpu.memory_space<vmem>>, %arg3: memref<1x128xf32, #tpu.memory_space<vmem>>, %arg4: memref<128x128xbf16, #tpu.memory_space<vmem>>, %arg5: memref<1x128xf32, #tpu.memory_space<vmem>>, %arg6: memref<128x16xbf16, #tpu.memory_space<vmem>>, %arg7: memref<1x16xf32, #tpu.memory_space<vmem>>, %arg8: memref<256x16xf32, #tpu.memory_space<vmem>>) attributes {dimension_semantics = [#tpu.dimension_semantics<parallel>], iteration_bounds = array<i64: 2>, scalar_prefetch = 0 : i64, scratch_operands = 0 : i64, tpu.core_type = #tpu.core_type<tc>, window_params = [{transform_indices = @transform_0, window_bounds = array<i64: 256, 32>}, {pipeline_mode = #tpu.pipeline_mode<synchronous>, transform_indices = @transform_1, window_bounds = array<i64: 32, 128>}, {pipeline_mode = #tpu.pipeline_mode<synchronous>, transform_indices = @transform_2, window_bounds = array<i64: 1, 128>}, {pipeline_mode = #tpu.pipeline_mode<synchronous>, transform_indices = @transform_3, window_bounds = array<i64: 128, 128>}, {pipeline_mode = #tpu.pipeline_mode<synchronous>, transform_indices = @transform_4, window_bounds = array<i64: 1, 128>}, {pipeline_mode = #tpu.pipeline_mode<synchronous>, transform_indices = @transform_5, window_bounds = array<i64: 128, 16>}, {pipeline_mode = #tpu.pipeline_mode<synchronous>, transform_indices = @transform_6, window_bounds = array<i64: 1, 16>}, {transform_indices = @transform_7, window_bounds = array<i64: 256, 16>}]} {
    %c0 = arith.constant 0 : index
    %c0_0 = arith.constant 0 : index
    %0 = vector.load %arg1[%c0, %c0_0] : memref<256x32xbf16, #tpu.memory_space<vmem>>, vector<256x32xbf16>
    %c0_1 = arith.constant 0 : index
    %c0_2 = arith.constant 0 : index
    %1 = vector.load %arg2[%c0_1, %c0_2] : memref<32x128xbf16, #tpu.memory_space<vmem>>, vector<32x128xbf16>
    %c0_3 = arith.constant 0 : index
    %c0_4 = arith.constant 0 : index
    %2 = vector.load %arg3[%c0_3, %c0_4] : memref<1x128xf32, #tpu.memory_space<vmem>>, vector<1x128xf32>
    %cst = arith.constant dense<0.000000e+00> : vector<256x128xf32>
    %3 = tpu.matmul %0, %1, %cst {dimension_numbers = #tpu.dot_dimension_numbers<[1], [0], [0], [1], [0, 0, 1, 1], [], []>} : vector<256x32xbf16>, vector<32x128xbf16>, vector<256x128xf32> -> vector<256x128xf32>
    %4 = vector.broadcast %2 : vector<1x128xf32> to vector<256x128xf32>
    %5 = arith.addf %3, %4 : vector<256x128xf32>
    %cst_5 = arith.constant 0.000000e+00 : f32
    %6 = vector.broadcast %cst_5 : f32 to vector<256x128xf32>
    %7 = arith.maximumf %5, %6 : vector<256x128xf32>
    %8 = arith.truncf %7 : vector<256x128xf32> to vector<256x128xbf16>
    %c0_6 = arith.constant 0 : index
    %c0_7 = arith.constant 0 : index
    %9 = vector.load %arg4[%c0_6, %c0_7] : memref<128x128xbf16, #tpu.memory_space<vmem>>, vector<128x128xbf16>
    %c0_8 = arith.constant 0 : index
    %c0_9 = arith.constant 0 : index
    %10 = vector.load %arg5[%c0_8, %c0_9] : memref<1x128xf32, #tpu.memory_space<vmem>>, vector<1x128xf32>
    %cst_10 = arith.constant dense<0.000000e+00> : vector<256x128xf32>
    %11 = tpu.matmul %8, %9, %cst_10 {dimension_numbers = #tpu.dot_dimension_numbers<[1], [0], [0], [1], [0, 0, 1, 1], [], []>} : vector<256x128xbf16>, vector<128x128xbf16>, vector<256x128xf32> -> vector<256x128xf32>
    %12 = vector.broadcast %10 : vector<1x128xf32> to vector<256x128xf32>
    %13 = arith.addf %11, %12 : vector<256x128xf32>
    %cst_11 = arith.constant 0.000000e+00 : f32
    %14 = vector.broadcast %cst_11 : f32 to vector<256x128xf32>
    %15 = arith.maximumf %13, %14 : vector<256x128xf32>
    %16 = arith.truncf %15 : vector<256x128xf32> to vector<256x128xbf16>
    %c0_12 = arith.constant 0 : index
    %c0_13 = arith.constant 0 : index
    %17 = vector.load %arg6[%c0_12, %c0_13] : memref<128x16xbf16, #tpu.memory_space<vmem>>, vector<128x16xbf16>
    %c0_14 = arith.constant 0 : index
    %c0_15 = arith.constant 0 : index
    %18 = vector.load %arg7[%c0_14, %c0_15] : memref<1x16xf32, #tpu.memory_space<vmem>>, vector<1x16xf32>
    %cst_16 = arith.constant dense<0.000000e+00> : vector<256x16xf32>
    %19 = tpu.matmul %16, %17, %cst_16 {dimension_numbers = #tpu.dot_dimension_numbers<[1], [0], [0], [1], [0, 0, 1, 1], [], []>} : vector<256x128xbf16>, vector<128x16xbf16>, vector<256x16xf32> -> vector<256x16xf32>
    %20 = vector.broadcast %18 : vector<1x16xf32> to vector<256x16xf32>
    %21 = arith.addf %19, %20 : vector<256x16xf32>
    %cst_17 = arith.constant dense<0xFF800000> : vector<256xf32>
    %22 = vector.multi_reduction <maximumf>, %21, %cst_17 [1] : vector<256x16xf32> to vector<256xf32>
    %23 = vector.shape_cast %22 : vector<256xf32> to vector<256x1xf32>
    %24 = vector.broadcast %23 : vector<256x1xf32> to vector<256x16xf32>
    %25 = arith.subf %21, %24 : vector<256x16xf32>
    %26 = math.exp %25 : vector<256x16xf32>
    %cst_18 = arith.constant dense<0.000000e+00> : vector<256xf32>
    %27 = vector.multi_reduction <add>, %26, %cst_18 [1] : vector<256x16xf32> to vector<256xf32>
    %28 = vector.shape_cast %27 : vector<256xf32> to vector<256x1xf32>
    %29 = vector.broadcast %28 : vector<256x1xf32> to vector<256x16xf32>
    %30 = arith.divf %26, %29 : vector<256x16xf32>
    %c0_19 = arith.constant 0 : index
    %c0_20 = arith.constant 0 : index
    %31 = vector.load %arg8[%c0_19, %c0_20] : memref<256x16xf32, #tpu.memory_space<vmem>>, vector<256x16xf32>
    tpu.vector_store %arg8[%c0_19, %c0_20], %30 {strides = array<i32>} : memref<256x16xf32, #tpu.memory_space<vmem>>, vector<256x16xf32>,
    return
  }
  func.func @transform_0(%arg0: i32) -> (i32, i32) {
    %c0_i32 = arith.constant 0 : i32
    %c0_i32_0 = arith.constant 0 : i32
    return %arg0, %c0_i32 : i32, i32
  }
  func.func @transform_1(%arg0: i32) -> (i32, i32) {
    %c0_i32 = arith.constant 0 : i32
    %c0_i32_0 = arith.constant 0 : i32
    %c0_i32_1 = arith.constant 0 : i32
    return %c0_i32, %c0_i32_0 : i32, i32
  }
  func.func @transform_2(%arg0: i32) -> (i32, i32) {
    %c0_i32 = arith.constant 0 : i32
    %c0_i32_0 = arith.constant 0 : i32
    %c0_i32_1 = arith.constant 0 : i32
    return %c0_i32, %c0_i32_0 : i32, i32
  }
  func.func @transform_3(%arg0: i32) -> (i32, i32) {
    %c0_i32 = arith.constant 0 : i32
    %c0_i32_0 = arith.constant 0 : i32
    %c0_i32_1 = arith.constant 0 : i32
    return %c0_i32, %c0_i32_0 : i32, i32
  }
  func.func @transform_4(%arg0: i32) -> (i32, i32) {
    %c0_i32 = arith.constant 0 : i32
    %c0_i32_0 = arith.constant 0 : i32
    %c0_i32_1 = arith.constant 0 : i32
    return %c0_i32, %c0_i32_0 : i32, i32
  }
  func.func @transform_5(%arg0: i32) -> (i32, i32) {
    %c0_i32 = arith.constant 0 : i32
    %c0_i32_0 = arith.constant 0 : i32
    %c0_i32_1 = arith.constant 0 : i32
    return %c0_i32, %c0_i32_0 : i32, i32
  }
  func.func @transform_6(%arg0: i32) -> (i32, i32) {
    %c0_i32 = arith.constant 0 : i32
    %c0_i32_0 = arith.constant 0 : i32
    %c0_i32_1 = arith.constant 0 : i32
    return %c0_i32, %c0_i32_0 : i32, i32
  }
  func.func @transform_7(%arg0: i32) -> (i32, i32) {
    %c0_i32 = arith.constant 0 : i32
    %c0_i32_0 = arith.constant 0 : i32
    return %arg0, %c0_i32 : i32, i32
  }
}

</mosaic_0001>

<bundles_post_ra>
// kernel: mlp_max_forward.1
= control target key start
LH: loop header
LB: loop body
LE: loop exit
PB: predicated region body
PF: predicated region fallthrough
CT: control target
= control target key end

     0   :  { %s2113_s24 = smov 0   ;;  %s2725_s0 = inlined_call_operand.vmem [shape: bf16[512,32], index: 0, kind: input, shape index: {}]   ;;  %s2726_s1 = inlined_call_operand.vmem [shape: bf16[32,128], index: 1, kind: input, shape index: {}]   ;;  %s2727_s2 = inlined_call_operand.vmem [shape: f32[1,128], index: 2, kind: input, shape index: {}]   ;;  %s2728_s3 = inlined_call_operand.vmem [shape: bf16[128,128], index: 3, kind: input, shape index: {}]   ;;  %s2729_s4 = inlined_call_operand.vmem [shape: f32[1,128], index: 4, kind: input, shape index: {}]   ;;  %s2730_s5 = inlined_call_operand.vmem [shape: bf16[128,16], index: 5, kind: input, shape index: {}]   ;;  %s2731_s6 = inlined_call_operand.vmem [shape: f32[1,16], index: 6, kind: input, shape index: {}]   ;;  %s2732_s7 = inlined_call_operand.vmem [shape: f32[512,16], index: 7, kind: output, shape index: {}]  }
   0x1 LB: > { %s1629_s25 = sadd.s32 4294967295, %s2071_s24   ;;  %p1633_p0 = scmp.ge.s32.totalorder %s2071_s24, 1  ;;  %s2071_s24 = sphi %s2113_s24, %s17_s24  }
   0x2   : > { %p238_p1 = scmp.lt.s32.totalorder %s2071_s24, 3 }
   0x4   : > { %p239_p2 = pnand %p1633_p0, %p238_p1 }
   0x5   : > { %v1903_v0 = vld [vmem:[%s2726_s1] sm:$0xff] (!%p239_p2)   ;;  %s1634_s28 = sshll.u32 (!%p239_p2), %s1629_s25, 5  ;;  %v1904_v1 = vld [vmem:[%s2726_s1 + $0x8] sm:$0xff] (!%p239_p2)   ;;  %vm418_vm0 = vcmask (!%p239_p2), 261120   ;;  %v1923_v12 = vld [vmem:[%s2728_s3 + $0x10] sm:$0xff] (!%p239_p2)   ;;  %vm1188_vm1 = vcmask (!%p239_p2), 130048  }
   0x6   : > { %242 = sbr.rel (%p239_p2) target bundleno = 1055 (0x41f), region = 48  ;;  %p271_p3 = scmp.lt.s32.totalorder (!%p239_p2), %s1634_s28, 63  ;;  %1759 = vmatprep.subr.bf16.mxu0 (!%p239_p2), %v1903_v0  ;;  %1891 = vmatprep.subr.bf16.mxu1 (!%p239_p2), %v1903_v0  ;;  %v1921_v2 = vld [vmem:[%s2728_s3] sm:$0xff] (!%p239_p2)   ;;  %v1922_v9 = vld [vmem:[%s2728_s3 + $0x8] sm:$0xff] (!%p239_p2)   ;;  %v1924_v17 = vld [vmem:[%s2728_s3 + $0x18] sm:$0xff] (!%p239_p2)  }
   0x7   : > { %1760 = vmatpush3.bf16.msra.mxu0 (!%p239_p2), %v1903_v0  ;;  %1893 = vmatpush3.bf16.msra.mxu1 (!%p239_p2), %v1903_v0  ;;  %v1925_v18 = vld [vmem:[%s2728_s3 + $0x20] sm:$0xff] (!%p239_p2)   ;;  %v1926_v22 = vld [vmem:[%s2728_s3 + $0x28] sm:$0xff] (!%p239_p2)   ;;  %v1927_v24 = vld [vmem:[%s2728_s3 + $0x30] sm:$0xff] (!%p239_p2)  }
   0x8   : > { %1761 = vmatprep.subr.bf16.mxu0 (!%p239_p2), %v1904_v1  ;;  %1892 = vmatprep.subr.bf16.mxu1 (!%p239_p2), %v1904_v1  ;;  %v1928_v25 = vld [vmem:[%s2728_s3 + $0x38] sm:$0xff] (!%p239_p2)   ;;  %v1929_v26 = vld [vmem:[%s2730_s5] sm:$0xff] (!%p239_p2)   ;;  %v1930_v27 = vld [vmem:[%s2730_s5 + $0x8] sm:$0xff] (!%p239_p2)  }
   0x9   : > { %v1931_v28 = vld [vmem:[%s2730_s5 + $0x10] sm:$0xff] (!%p239_p2)   ;;  %v1932_v29 = vld [vmem:[%s2730_s5 + $0x18] sm:$0xff] (!%p239_p2)   ;;  %v1933_v30 = vld [vmem:[%s2730_s5 + $0x20] sm:$0xff] (!%p239_p2)  }
   0xa   : > { %v1934_v31 = vld [vmem:[%s2730_s5 + $0x28] sm:$0xff] (!%p239_p2)   ;;  %v2212_v32 = vld [vmem:[%s2727_s2] ss:$0 sm:$0xff] (!%p239_p2) }
   0xb   : > { %1762 = vmatpush3.bf16.msra.mxu0 (!%p239_p2), %v1904_v1  ;;  %1894 = vmatpush3.bf16.msra.mxu1 (!%p239_p2), %v1904_v1 }
   0xc   : > { %1795 = vmatprep.subr.bf16.mxu1 (!%p239_p2), %v1921_v2  ;;  %1843 = vmatprep.subr.bf16.mxu0 (!%p239_p2), %v1929_v26 }
   0xd   : > { %s2734_s28 = smov (!%p271_p3, %s1634_s28), 63 }
   0xe   : > { %s1635_s10 = sshll.u32 %s2734_s28, 2  ;;  %s1637_s8 = sshll.u32 %s2734_s28, 3 }
   0xf   : > { %s2136_s13 = scalar_lea.vmem %s2725_s0, %s1635_s10  ;;  %s2624_s11 = scalar_lea.vmem %s2732_s7, %s1637_s8 }
  0x10   : > { %v1905_v3 = vld [vmem:[%s2136_s13] sm:$0xff]   ;;  %v1906_v4 = vld [vmem:[%s2136_s13 + $0x8] sm:$0xff]   ;;  %v1907_v5 = vld [vmem:[%s2136_s13 + $0x10] sm:$0xff]  }
  0x11   : > { %1763 = vmatprep.mubr.msk.bf16.mxu0 %vm418_vm0, %v1905_v3  ;;  %v1908_v6 = vld [vmem:[%s2136_s13 + $0x18] sm:$0xff]   ;;  %v1909_v7 = vld [vmem:[%s2136_s13 + $0x20] sm:$0xff]   ;;  %v1914_v10 = vld [vmem:[%s2136_s13 + $0x48] sm:$0xff]  }
  0x12   : > { %1764 = vmatmul.mubr.msk.bf16.vlgmr.msra.gmra.mrb[0].mxu0 %vm418_vm0, %v1906_v4  ;;  %v1913_v8 = vld [vmem:[%s2136_s13 + $0x40] sm:$0xff]   ;;  %v1915_v11 = vld [vmem:[%s2136_s13 + $0x50] sm:$0xff]   ;;  %v1910_v13 = vld [vmem:[%s2136_s13 + $0x28] sm:$0xff]  }
  0x13   : > { %1767 = vmatprep.mubr.msk.bf16.mxu0 %vm418_vm0, %v1907_v5  ;;  %1779 = vmatprep.mubr.msk.bf16.mxu1 %vm418_vm0, %v1913_v8  ;;  %v1911_v14 = vld [vmem:[%s2136_s13 + $0x30] sm:$0xff]   ;;  %v1916_v15 = vld [vmem:[%s2136_s13 + $0x58] sm:$0xff]   ;;  %v1917_v16 = vld [vmem:[%s2136_s13 + $0x60] sm:$0xff]  }
  0x14   : > { %1780 = vmatmul.mubr.msk.bf16.vlgmr.msra.gmra.mrb[0].mxu1 %vm418_vm0, %v1914_v10  ;;  %v1912_v19 = vld [vmem:[%s2136_s13 + $0x38] sm:$0xff]   ;;  %v1918_v20 = vld [vmem:[%s2136_s13 + $0x68] sm:$0xff]   ;;  %v1919_v21 = vld [vmem:[%s2136_s13 + $0x70] sm:$0xff]   ;;  %1844 = vmatpush3.bf16.msra.mxu0 %v1929_v26 }
  0x15   : > { %1783 = vmatprep.mubr.msk.bf16.mxu1 %vm418_vm0, %v1915_v11  ;;  %1796 = vmatpush3.bf16.msra.mxu1 %v1921_v2  ;;  %v1920_v23 = vld [vmem:[%s2136_s13 + $0x78] sm:$0xff]  }
  0x16   : > { %1797 = vmatprep.subr.bf16.mxu1 %v1922_v9  ;;  %1845 = vmatprep.subr.bf16.mxu0 %v1930_v27 }
  0x18   : > { %1846 = vmatpush3.bf16.msra.mxu0 %v1930_v27 }
  0x19   : > { %1798 = vmatpush3.bf16.msra.mxu1 %v1922_v9  ;;  %1847 = vmatprep.subr.bf16.mxu0 %v1931_v28 }
  0x1a   : > { %1768 = vmatmul.mubr.msk.bf16.gmra.mrb[4].mxu0 %vm418_vm0, %v1908_v6  ;;  %1799 = vmatprep.subr.bf16.mxu1 %v1923_v12 }
  0x1b   : > { %1771 = vmatprep.mubr.msk.bf16.mxu0 %vm418_vm0, %v1909_v7 }
  0x1c   : > { %1784 = vmatmul.mubr.msk.bf16.gmra.mrb[4].mxu1 %vm418_vm0, %v1916_v15  ;;  %1848 = vmatpush3.bf16.msra.mxu0 %v1931_v28 }
  0x1d   : > { %1787 = vmatprep.mubr.msk.bf16.mxu1 %vm418_vm0, %v1917_v16  ;;  %1800 = vmatpush3.bf16.msra.mxu1 %v1923_v12 }
  0x1e   : > { %1801 = vmatprep.subr.bf16.mxu1 %v1924_v17  ;;  %1849 = vmatprep.subr.bf16.mxu0 %v1932_v29 }
  0x20   : > { %1850 = vmatpush3.bf16.msra.mxu0 %v1932_v29 }
  0x21   : > { %1802 = vmatpush3.bf16.msra.mxu1 %v1924_v17  ;;  %1851 = vmatprep.subr.bf16.mxu0 %v1933_v30 }
  0x22   : > { %1772 = vmatmul.mubr.msk.bf16.gmra.mrb[8].mxu0 %vm418_vm0, %v1910_v13  ;;  %1803 = vmatprep.subr.bf16.mxu1 %v1925_v18 }
  0x23   : > { %1775 = vmatprep.mubr.msk.bf16.mxu0 %vm418_vm0, %v1911_v14 }
  0x24   : > { %1788 = vmatmul.mubr.msk.bf16.gmra.mrb[8].mxu1 %vm418_vm0, %v1918_v20  ;;  %1852 = vmatpush3.bf16.msra.mxu0 %v1933_v30 }
  0x25   : > { %1791 = vmatprep.mubr.msk.bf16.mxu1 %vm418_vm0, %v1919_v21  ;;  %1804 = vmatpush3.bf16.msra.mxu1 %v1925_v18 }
  0x26   : > { %1805 = vmatprep.subr.bf16.mxu1 %v1926_v22  ;;  %1853 = vmatprep.subr.bf16.mxu0 %v1934_v31 }
  0x28   : > { %1854 = vmatpush3.bf16.msra.mxu0 %v1934_v31 }
  0x29   : > { %1806 = vmatpush3.bf16.msra.mxu1 %v1926_v22 }
  0x2a   : > { %1776 = vmatmul.mubr.msk.bf16.gmra.mrb[12].mxu0 %vm418_vm0, %v1912_v19  ;;  %1807 = vmatprep.subr.bf16.mxu1 %v1927_v24 }
  0x2c   : > { %1792 = vmatmul.mubr.msk.bf16.gmra.mrb[12].mxu1 %vm418_vm0, %v1920_v23 }
  0x2d   : > { %1808 = vmatpush3.bf16.msra.mxu1 %v1927_v24 }
  0x2e   : > { %1809 = vmatprep.subr.bf16.mxu1 %v1928_v25 }
  0x31   : > { %1810 = vmatpush3.bf16.msra.mxu1 %v1928_v25 }
  0xe5   : > { %v1765_v33 = vpop.f32.mrb[0].mxu0 }
  0xe6   : > { %v510_v34 = vadd.f32 %v1765_v33, %v2212_v32  ;;  %v501_v35 = vpop.f32.mrb[1].mxu0 }
  0xe7   : > { %v502_v36 = vadd.f32 %v2212_v32, %v501_v35  ;;  %v1766_v37 = vpop.f32.mrb[2].mxu0  ;;  %v1781_v48 = vpop.f32.mrb[0].mxu1 }
  0xe8   : > { %v513_v38 = vadd.f32 %v1766_v37, %v2212_v32  ;;  %v504_v39 = vpop.f32.mrb[3].mxu0  ;;  %v630_v41 = vmax.f32 %v510_v34, 0.0  ;;  %v574_v51 = vadd.f32 %v1781_v48, %v2212_v32  ;;  %v565_v52 = vpop.f32.mrb[1].mxu1 }
  0xe9   : > { %v505_v40 = vadd.f32 %v2212_v32, %v504_v39  ;;  %v628_v43 = vmax.f32 %v502_v36, 0.0  ;;  %v566_v55 = vadd.f32 %v2212_v32, %v565_v52  ;;  %v1782_v56 = vpop.f32.mrb[2].mxu1 }
  0xea   : > { %v631_v42 = vmax.f32 %v513_v38, 0.0  ;;  %v646_v60 = vmax.f32 %v574_v51, 0.0  ;;  %v577_v61 = vadd.f32 %v1782_v56, %v2212_v32  ;;  %v568_v62 = vpop.f32.mrb[3].mxu1 }
  0xeb   : > { %v629_v44 = vmax.f32 %v505_v40, 0.0  ;;  %v644_v0 = vmax.f32 %v566_v55, 0.0  ;;  %v569_v1 = vadd.f32 %v2212_v32, %v568_v62 }
  0xec   : > { %v661_v45 = vpack.c.bf16 %v631_v42, %v630_v41  ;;  %v647_v3 = vmax.f32 %v577_v61, 0.0 }
  0xed   : > { %v660_v46 = vpack.c.bf16 %v629_v44, %v628_v43  ;;  %v1769_v47 = vpop.f32.mrb[4].mxu0  ;;  %v645_v6 = vmax.f32 %v569_v1, 0.0 }
  0xee   : > { %v526_v49 = vadd.f32 %v1769_v47, %v2212_v32  ;;  %v517_v50 = vpop.f32.mrb[5].mxu0  ;;  %v2226_v8 = vpack.c.bf16 %v647_v3, %v646_v60 }
  0xef   : > { %v518_v53 = vadd.f32 %v2212_v32, %v517_v50  ;;  %v1770_v54 = vpop.f32.mrb[6].mxu0  ;;  %1811 = vmatprep.mubr.bf16.mxu1 %v660_v46  ;;  %v2228_v11 = vpack.c.bf16 %v645_v6, %v644_v0  ;;  %v1785_v12 = vpop.f32.mrb[4].mxu1 }
  0xf0   : > { %v634_v57 = vmax.f32 %v526_v49, 0.0  ;;  %v529_v58 = vadd.f32 %v1770_v54, %v2212_v32  ;;  %v520_v59 = vpop.f32.mrb[7].mxu0  ;;  %1812 = vmatmul.mubr.bf16.vlgmr.msra.gmra.mrb[16].mxu1 %v661_v45  ;;  %v590_v15 = vadd.f32 %v1785_v12, %v2212_v32  ;;  %v581_v16 = vpop.f32.mrb[5].mxu1 }
  0xf1   : > { %v521_v63 = vadd.f32 %v2212_v32, %v520_v59  ;;  %v632_v4 = vmax.f32 %v518_v53, 0.0  ;;  %v582_v19 = vadd.f32 %v2212_v32, %v581_v16  ;;  %v1786_v20 = vpop.f32.mrb[6].mxu1 }
  0xf2   : > { %v635_v2 = vmax.f32 %v529_v58, 0.0  ;;  %v650_v24 = vmax.f32 %v590_v15, 0.0  ;;  %v593_v25 = vadd.f32 %v1786_v20, %v2212_v32  ;;  %v584_v26 = vpop.f32.mrb[7].mxu1  ;;  %v1935_v20 = vld [vmem:[%s2730_s5 + $0x30] sm:$0xff]  }
  0xf3   : > { %v633_v5 = vmax.f32 %v521_v63, 0.0  ;;  %v648_v28 = vmax.f32 %v582_v19, 0.0  ;;  %v585_v29 = vadd.f32 %v2212_v32, %v584_v26  ;;  %1855 = vmatprep.subr.bf16.mxu0 %v1935_v20 }
  0xf4   : > { %v663_v7 = vpack.c.bf16 %v635_v2, %v634_v57  ;;  %v651_v31 = vmax.f32 %v593_v25, 0.0  ;;  %1856 = vmatpush3.bf16.msra.mxu0 %v1935_v20 }
  0xf5   : > { %v662_v9 = vpack.c.bf16 %v633_v5, %v632_v4  ;;  %v1773_v10 = vpop.f32.mrb[8].mxu0  ;;  %v649_v35 = vmax.f32 %v585_v29, 0.0 }
  0xf6   : > { %v542_v13 = vadd.f32 %v1773_v10, %v2212_v32  ;;  %v533_v14 = vpop.f32.mrb[9].mxu0  ;;  %v671_v37 = vpack.c.bf16 %v651_v31, %v650_v24 }
  0xf7   : > { %v534_v17 = vadd.f32 %v2212_v32, %v533_v14  ;;  %v1774_v18 = vpop.f32.mrb[10].mxu0  ;;  %1815 = vmatprep.mubr.bf16.mxu1 %v662_v9  ;;  %v670_v40 = vpack.c.bf16 %v649_v35, %v648_v28  ;;  %v1789_v41 = vpop.f32.mrb[8].mxu1 }
  0xf8   : > { %v638_v21 = vmax.f32 %v542_v13, 0.0  ;;  %v545_v22 = vadd.f32 %v1774_v18, %v2212_v32  ;;  %v536_v23 = vpop.f32.mrb[11].mxu0  ;;  %1816 = vmatmul.mubr.bf16.gmra.mrb[20].mxu1 %v663_v7  ;;  %v606_v44 = vadd.f32 %v1789_v41, %v2212_v32  ;;  %v597_v45 = vpop.f32.mrb[9].mxu1 }
  0xf9   : > { %v537_v27 = vadd.f32 %v2212_v32, %v536_v23  ;;  %v636_v33 = vmax.f32 %v534_v17, 0.0  ;;  %v598_v48 = vadd.f32 %v2212_v32, %v597_v45  ;;  %v1790_v49 = vpop.f32.mrb[10].mxu1 }
  0xfa   : > { %v639_v30 = vmax.f32 %v545_v22, 0.0  ;;  %v654_v53 = vmax.f32 %v606_v44, 0.0  ;;  %v609_v54 = vadd.f32 %v1790_v49, %v2212_v32  ;;  %v600_v55 = vpop.f32.mrb[11].mxu1 }
  0xfb   : > { %v637_v34 = vmax.f32 %v537_v27, 0.0  ;;  %v652_v57 = vmax.f32 %v598_v48, 0.0  ;;  %v601_v58 = vadd.f32 %v2212_v32, %v600_v55 }
  0xfc   : > { %v665_v36 = vpack.c.bf16 %v639_v30, %v638_v21  ;;  %v655_v60 = vmax.f32 %v609_v54, 0.0 }
  0xfd   : > { %v664_v38 = vpack.c.bf16 %v637_v34, %v636_v33  ;;  %v1777_v39 = vpop.f32.mrb[12].mxu0  ;;  %v653_v63 = vmax.f32 %v601_v58, 0.0 }
  0xfe   : > { %v558_v42 = vadd.f32 %v1777_v39, %v2212_v32  ;;  %v549_v43 = vpop.f32.mrb[13].mxu0  ;;  %v673_v1 = vpack.c.bf16 %v655_v60, %v654_v53 }
  0xff   : > { %v550_v46 = vadd.f32 %v2212_v32, %v549_v43  ;;  %v1778_v47 = vpop.f32.mrb[14].mxu0  ;;  %1819 = vmatprep.mubr.bf16.mxu1 %v664_v38  ;;  %v672_v3 = vpack.c.bf16 %v653_v63, %v652_v57  ;;  %v1793_v4 = vpop.f32.mrb[12].mxu1 }
 0x100   : > { %v642_v50 = vmax.f32 %v558_v42, 0.0  ;;  %v561_v51 = vadd.f32 %v1778_v47, %v2212_v32  ;;  %v552_v52 = vpop.f32.mrb[15].mxu0  ;;  %1820 = vmatmul.mubr.bf16.gmra.mrb[24].mxu1 %v665_v36  ;;  %v622_v5 = vadd.f32 %v1793_v4, %v2212_v32  ;;  %v613_v6 = vpop.f32.mrb[13].mxu1 }
 0x101   : > { %v553_v56 = vadd.f32 %v2212_v32, %v552_v52  ;;  %v640_v61 = vmax.f32 %v550_v46, 0.0  ;;  %v614_v7 = vadd.f32 %v2212_v32, %v613_v6  ;;  %v1794_v9 = vpop.f32.mrb[14].mxu1 }
 0x102   : > { %v643_v59 = vmax.f32 %v561_v51, 0.0  ;;  %v658_v10 = vmax.f32 %v622_v5, 0.0  ;;  %v625_v12 = vadd.f32 %v1794_v9, %v2212_v32  ;;  %v616_v13 = vpop.f32.mrb[15].mxu1 }
 0x103   : > { %v641_v62 = vmax.f32 %v553_v56, 0.0  ;;  %v656_v14 = vmax.f32 %v614_v7, 0.0  ;;  %v617_v15 = vadd.f32 %v2212_v32, %v616_v13  ;;  %v1936_v32 = vld [vmem:[%s2730_s5 + $0x38] sm:$0xff]  }
 0x104   : > { %v667_v0 = vpack.c.bf16 %v643_v59, %v642_v50  ;;  %v659_v16 = vmax.f32 %v625_v12, 0.0  ;;  %1857 = vmatprep.subr.bf16.mxu0 %v1936_v32 }
 0x105   : > { %v666_v2 = vpack.c.bf16 %v641_v62, %v640_v61  ;;  %v657_v17 = vmax.f32 %v617_v15, 0.0  ;;  %1858 = vmatpush3.bf16.msra.mxu0 %v1936_v32 }
 0x106   : > { %v675_v18 = vpack.c.bf16 %v659_v16, %v658_v10 }
 0x107   : > { %1823 = vmatprep.mubr.bf16.mxu1 %v666_v2  ;;  %v674_v19 = vpack.c.bf16 %v657_v17, %v656_v14 }
 0x108   : > { %1824 = vmatmul.mubr.bf16.gmra.mrb[28].mxu1 %v667_v0 }
 0x109   : > { %1827 = vmatprep.mubr.bf16.mxu1 %v2228_v11 }
 0x110   : > { %1828 = vmatmul.mubr.bf16.gmra.mrb[32].mxu1 %v2226_v8  ;;  %v2261_v8 = vld [vmem:[%s2729_s4] ss:$0 sm:$0xff] }
 0x111   : > { %1831 = vmatprep.mubr.bf16.mxu1 %v670_v40 }
 0x118   : > { %1832 = vmatmul.mubr.bf16.gmra.mrb[36].mxu1 %v671_v37 }
 0x119   : > { %1835 = vmatprep.mubr.bf16.mxu1 %v672_v3 }
 0x120   : > { %1836 = vmatmul.mubr.bf16.gmra.mrb[40].mxu1 %v673_v1 }
 0x121   : > { %1839 = vmatprep.mubr.bf16.mxu1 %v674_v19 }
 0x128   : > { %1840 = vmatmul.mubr.bf16.gmra.mrb[44].mxu1 %v675_v18 }
 0x1c3   : > { %v1813_v11 = vpop.f32.mrb[16].mxu1 }
 0x1c4   : > { %v790_v21 = vadd.f32 %v1813_v11, %v2261_v8  ;;  %v781_v22 = vpop.f32.mrb[17].mxu1 }
 0x1c5   : > { %v782_v23 = vadd.f32 %v2261_v8, %v781_v22  ;;  %v1814_v24 = vpop.f32.mrb[18].mxu1 }
 0x1c6   : > { %v793_v25 = vadd.f32 %v1814_v24, %v2261_v8  ;;  %v784_v26 = vpop.f32.mrb[19].mxu1  ;;  %v910_v28 = vmax.f32 %v790_v21, 0.0 }
 0x1c7   : > { %v785_v27 = vadd.f32 %v2261_v8, %v784_v26  ;;  %v908_v30 = vmax.f32 %v782_v23, 0.0 }
 0x1c8   : > { %v911_v29 = vmax.f32 %v793_v25, 0.0 }
 0x1c9   : > { %v909_v31 = vmax.f32 %v785_v27, 0.0 }
 0x1ca   : > { %v941_v33 = vpack.c.bf16 %v911_v29, %v910_v28 }
 0x1cb   : > { %v940_v34 = vpack.c.bf16 %v909_v31, %v908_v30  ;;  %v1817_v35 = vpop.f32.mrb[20].mxu1 }
 0x1cc   : > { %v806_v36 = vadd.f32 %v1817_v35, %v2261_v8  ;;  %v797_v37 = vpop.f32.mrb[21].mxu1 }
 0x1cd   : > { %v798_v38 = vadd.f32 %v2261_v8, %v797_v37  ;;  %v1818_v39 = vpop.f32.mrb[22].mxu1  ;;  %1859 = vmatprep.mubr.bf16.mxu0 %v940_v34 }
 0x1ce   : > { %v809_v40 = vadd.f32 %v1818_v39, %v2261_v8  ;;  %v800_v41 = vpop.f32.mrb[23].mxu1  ;;  %1860 = vmatmul.mubr.bf16.vlgmr.msra.gmra.mrb[16].mxu0 %v941_v33  ;;  %v914_v43 = vmax.f32 %v806_v36, 0.0 }
 0x1cf   : > { %v801_v42 = vadd.f32 %v2261_v8, %v800_v41  ;;  %v912_v45 = vmax.f32 %v798_v38, 0.0 }
 0x1d0   : > { %v915_v44 = vmax.f32 %v809_v40, 0.0 }
 0x1d1   : > { %v913_v46 = vmax.f32 %v801_v42, 0.0 }
 0x1d2   : > { %v943_v47 = vpack.c.bf16 %v915_v44, %v914_v43 }
 0x1d3   : > { %v942_v48 = vpack.c.bf16 %v913_v46, %v912_v45  ;;  %v1821_v49 = vpop.f32.mrb[24].mxu1 }
 0x1d4   : > { %v822_v50 = vadd.f32 %v1821_v49, %v2261_v8  ;;  %v813_v51 = vpop.f32.mrb[25].mxu1 }
 0x1d5   : > { %v814_v52 = vadd.f32 %v2261_v8, %v813_v51  ;;  %v1822_v53 = vpop.f32.mrb[26].mxu1  ;;  %1863 = vmatprep.mubr.bf16.mxu0 %v942_v48 }
 0x1d6   : > { %v825_v54 = vadd.f32 %v1822_v53, %v2261_v8  ;;  %v816_v55 = vpop.f32.mrb[27].mxu1  ;;  %1864 = vmatmul.mubr.bf16.gmra.mrb[20].mxu0 %v943_v47  ;;  %v918_v57 = vmax.f32 %v822_v50, 0.0 }
 0x1d7   : > { %v817_v56 = vadd.f32 %v2261_v8, %v816_v55  ;;  %v916_v59 = vmax.f32 %v814_v52, 0.0 }
 0x1d8   : > { %v919_v58 = vmax.f32 %v825_v54, 0.0 }
 0x1d9   : > { %v917_v60 = vmax.f32 %v817_v56, 0.0 }
 0x1da   : > { %v945_v61 = vpack.c.bf16 %v919_v58, %v918_v57 }
 0x1db   : > { %v944_v62 = vpack.c.bf16 %v917_v60, %v916_v59  ;;  %v1825_v63 = vpop.f32.mrb[28].mxu1 }
 0x1dc   : > { %v838_v0 = vadd.f32 %v1825_v63, %v2261_v8  ;;  %v829_v1 = vpop.f32.mrb[29].mxu1 }
 0x1dd   : > { %v830_v2 = vadd.f32 %v2261_v8, %v829_v1  ;;  %v1826_v3 = vpop.f32.mrb[30].mxu1  ;;  %1867 = vmatprep.mubr.bf16.mxu0 %v944_v62 }
 0x1de   : > { %v841_v4 = vadd.f32 %v1826_v3, %v2261_v8  ;;  %v832_v5 = vpop.f32.mrb[31].mxu1  ;;  %1868 = vmatmul.mubr.bf16.gmra.mrb[24].mxu0 %v945_v61  ;;  %v922_v7 = vmax.f32 %v838_v0, 0.0 }
 0x1df   : > { %v833_v6 = vadd.f32 %v2261_v8, %v832_v5  ;;  %v920_v10 = vmax.f32 %v830_v2, 0.0 }
 0x1e0   : > { %v923_v9 = vmax.f32 %v841_v4, 0.0 }
 0x1e1   : > { %v921_v12 = vmax.f32 %v833_v6, 0.0  ;;  %v2298_v6 = vld [vmem:[%s2731_s6] ss:$0 sm:$0xff] }
 0x1e2   : > { %v947_v13 = vpack.c.bf16 %v923_v9, %v922_v7 }
 0x1e3   : > { %v946_v14 = vpack.c.bf16 %v921_v12, %v920_v10  ;;  %v1829_v15 = vpop.f32.mrb[32].mxu1 }
 0x1e4   : > { %v854_v16 = vadd.f32 %v1829_v15, %v2261_v8  ;;  %v845_v17 = vpop.f32.mrb[33].mxu1 }
 0x1e5   : > { %v846_v18 = vadd.f32 %v2261_v8, %v845_v17  ;;  %v1830_v19 = vpop.f32.mrb[34].mxu1  ;;  %1871 = vmatprep.mubr.bf16.mxu0 %v946_v14 }
 0x1e6   : > { %v857_v20 = vadd.f32 %v1830_v19, %v2261_v8  ;;  %v848_v32 = vpop.f32.mrb[35].mxu1  ;;  %1872 = vmatmul.mubr.bf16.gmra.mrb[28].mxu0 %v947_v13  ;;  %v926_v21 = vmax.f32 %v854_v16, 0.0 }
 0x1e7   : > { %v849_v11 = vadd.f32 %v2261_v8, %v848_v32  ;;  %v924_v23 = vmax.f32 %v846_v18, 0.0 }
 0x1e8   : > { %v927_v22 = vmax.f32 %v857_v20, 0.0 }
 0x1e9   : > { %v925_v24 = vmax.f32 %v849_v11, 0.0 }
 0x1ea   : > { %v949_v25 = vpack.c.bf16 %v927_v22, %v926_v21 }
 0x1eb   : > { %v948_v26 = vpack.c.bf16 %v925_v24, %v924_v23  ;;  %v1833_v27 = vpop.f32.mrb[36].mxu1 }
 0x1ec   : > { %v870_v28 = vadd.f32 %v1833_v27, %v2261_v8  ;;  %v861_v29 = vpop.f32.mrb[37].mxu1 }
 0x1ed   : > { %v862_v30 = vadd.f32 %v2261_v8, %v861_v29  ;;  %v1834_v31 = vpop.f32.mrb[38].mxu1  ;;  %1875 = vmatprep.mubr.bf16.mxu0 %v948_v26 }
 0x1ee   : > { %v873_v33 = vadd.f32 %v1834_v31, %v2261_v8  ;;  %v864_v34 = vpop.f32.mrb[39].mxu1  ;;  %1876 = vmatmul.mubr.bf16.gmra.mrb[32].mxu0 %v949_v25  ;;  %v930_v36 = vmax.f32 %v870_v28, 0.0 }
 0x1ef   : > { %v865_v35 = vadd.f32 %v2261_v8, %v864_v34  ;;  %v928_v38 = vmax.f32 %v862_v30, 0.0 }
 0x1f0   : > { %v931_v37 = vmax.f32 %v873_v33, 0.0 }
 0x1f1   : > { %v929_v39 = vmax.f32 %v865_v35, 0.0 }
 0x1f2   : > { %v951_v40 = vpack.c.bf16 %v931_v37, %v930_v36 }
 0x1f3   : > { %v950_v41 = vpack.c.bf16 %v929_v39, %v928_v38  ;;  %v1837_v42 = vpop.f32.mrb[40].mxu1 }
 0x1f4   : > { %v886_v43 = vadd.f32 %v1837_v42, %v2261_v8  ;;  %v877_v44 = vpop.f32.mrb[41].mxu1 }
 0x1f5   : > { %v878_v45 = vadd.f32 %v2261_v8, %v877_v44  ;;  %v1838_v46 = vpop.f32.mrb[42].mxu1  ;;  %1879 = vmatprep.mubr.bf16.mxu0 %v950_v41 }
 0x1f6   : > { %v889_v47 = vadd.f32 %v1838_v46, %v2261_v8  ;;  %v880_v48 = vpop.f32.mrb[43].mxu1  ;;  %1880 = vmatmul.mubr.bf16.gmra.mrb[36].mxu0 %v951_v40  ;;  %v934_v50 = vmax.f32 %v886_v43, 0.0 }
 0x1f7   : > { %v881_v49 = vadd.f32 %v2261_v8, %v880_v48  ;;  %v932_v52 = vmax.f32 %v878_v45, 0.0 }
 0x1f8   : > { %v935_v51 = vmax.f32 %v889_v47, 0.0 }
 0x1f9   : > { %v933_v53 = vmax.f32 %v881_v49, 0.0 }
 0x1fa   : > { %v953_v54 = vpack.c.bf16 %v935_v51, %v934_v50 }
 0x1fb   : > { %v952_v55 = vpack.c.bf16 %v933_v53, %v932_v52  ;;  %v1841_v56 = vpop.f32.mrb[44].mxu1 }
 0x1fc   : > { %v902_v57 = vadd.f32 %v1841_v56, %v2261_v8  ;;  %v893_v58 = vpop.f32.mrb[45].mxu1 }
 0x1fd   : > { %v894_v59 = vadd.f32 %v2261_v8, %v893_v58  ;;  %v1842_v60 = vpop.f32.mrb[46].mxu1  ;;  %1883 = vmatprep.mubr.bf16.mxu0 %v952_v55 }
 0x1fe   : > { %v905_v61 = vadd.f32 %v1842_v60, %v2261_v8  ;;  %v896_v62 = vpop.f32.mrb[47].mxu1  ;;  %1884 = vmatmul.mubr.bf16.gmra.mrb[40].mxu0 %v953_v54  ;;  %v938_v0 = vmax.f32 %v902_v57, 0.0 }
 0x1ff   : > { %v897_v63 = vadd.f32 %v2261_v8, %v896_v62  ;;  %v936_v2 = vmax.f32 %v894_v59, 0.0 }
 0x200   : > { %v939_v1 = vmax.f32 %v905_v61, 0.0 }
 0x201   : > { %v937_v3 = vmax.f32 %v897_v63, 0.0 }
 0x202   : > { %v955_v4 = vpack.c.bf16 %v939_v1, %v938_v0 }
 0x203   : > { %v954_v5 = vpack.c.bf16 %v937_v3, %v936_v2 }
 0x205   : > { %1887 = vmatprep.mubr.bf16.mxu0 %v954_v5 }
 0x206   : > { %1888 = vmatmul.mubr.bf16.gmra.mrb[44].mxu0 %v955_v4 }
 0x2a1   : > { %v1861_v7 = vpop.f32.mrb[16].mxu0 }
 0x2a2   : > { %v2301_v9 = vadd.f32 %v1861_v7, %v2298_v6  ;;  %v1061_v10 = vpop.f32.mrb[17].mxu0 }
 0x2a3   : > { %v2304_v8 = vadd.f32 %v2298_v6, %v1061_v10  ;;  %v1862_v12 = vpop.f32.mrb[18].mxu0 }
 0x2a4   : > { %v2307_v13 = vadd.f32 %v1862_v12, %v2298_v6  ;;  %v1064_v14 = vpop.f32.mrb[19].mxu0  ;;  %v1195_v15 = vsel %vm1188_vm1, %v2301_v9, -inf }
 0x2a5   : > { %v2312_v16 = vadd.f32 %v2298_v6, %v1064_v14  ;;  %1196 = vmax.xlane.f32.xlu1 %v1195_v15  ;;  %v1189_v17 = vsel %vm1188_vm1, %v2304_v8, -inf }
 0x2a6   : > { %1190 = vmax.xlane.f32.xlu0 %v1189_v17  ;;  %v1198_v18 = vsel %vm1188_vm1, %v2307_v13, -inf }
 0x2a7   : > { %v1192_v20 = vsel %vm1188_vm1, %v2312_v16, -inf }
 0x2a9   : > { %1199 = vmax.xlane.f32.xlu1 %v1198_v18  ;;  %v1865_v19 = vpop.f32.mrb[20].mxu0 }
 0x2aa   : > { %v2321_v32 = vadd.f32 %v1865_v19, %v2298_v6  ;;  %v1077_v11 = vpop.f32.mrb[21].mxu0  ;;  %1193 = vmax.xlane.f32.xlu0 %v1192_v20 }
 0x2ab   : > { %v1866_v21 = vpop.f32.mrb[22].mxu0  ;;  %v2329_v25 = vadd.f32 %v2298_v6, %v1077_v11 }
 0x2ac   : > { %v2324_v22 = vadd.f32 %v1866_v21, %v2298_v6  ;;  %v1080_v23 = vpop.f32.mrb[23].mxu0  ;;  %v1207_v24 = vsel %vm1188_vm1, %v2321_v32, -inf }
 0x2ad   : > { %v2332_v26 = vadd.f32 %v2298_v6, %v1080_v23  ;;  %v1201_v29 = vsel %vm1188_vm1, %v2329_v25, -inf }
 0x2ae   : > { %1208 = vmax.xlane.f32.xlu0 %v1207_v24  ;;  %v1210_v27 = vsel %vm1188_vm1, %v2324_v22, -inf }
 0x2af   : > { %1211 = vmax.xlane.f32.xlu1 %v1210_v27  ;;  %v1204_v33 = vsel %vm1188_vm1, %v2332_v26, -inf }
 0x2b1   : > { %v1869_v28 = vpop.f32.mrb[24].mxu0 }
 0x2b2   : > { %v2339_v30 = vadd.f32 %v1869_v28, %v2298_v6  ;;  %v1093_v31 = vpop.f32.mrb[25].mxu0  ;;  %1202 = vmax.xlane.f32.xlu0 %v1201_v29 }
 0x2b3   : > { %v1870_v34 = vpop.f32.mrb[26].mxu0  ;;  %1205 = vmax.xlane.f32.xlu1 %v1204_v33  ;;  %v2349_v38 = vadd.f32 %v2298_v6, %v1093_v31 }
 0x2b4   : > { %v2344_v35 = vadd.f32 %v1870_v34, %v2298_v6  ;;  %v1096_v36 = vpop.f32.mrb[27].mxu0  ;;  %v1219_v37 = vsel %vm1188_vm1, %v2339_v30, -inf }
 0x2b5   : > { %v2352_v39 = vadd.f32 %v2298_v6, %v1096_v36  ;;  %v1213_v42 = vsel %vm1188_vm1, %v2349_v38, -inf }
 0x2b6   : > { %1220 = vmax.xlane.f32.xlu0 %v1219_v37  ;;  %v1222_v40 = vsel %vm1188_vm1, %v2344_v35, -inf }
 0x2b7   : > { %1223 = vmax.xlane.f32.xlu1 %v1222_v40  ;;  %v1216_v45 = vsel %vm1188_vm1, %v2352_v39, -inf }
 0x2b9   : > { %v1873_v41 = vpop.f32.mrb[28].mxu0 }
 0x2ba   : > { %v2359_v43 = vadd.f32 %v1873_v41, %v2298_v6  ;;  %v1109_v44 = vpop.f32.mrb[29].mxu0  ;;  %1214 = vmax.xlane.f32.xlu0 %v1213_v42 }
 0x2bb   : > { %v1874_v46 = vpop.f32.mrb[30].mxu0  ;;  %1217 = vmax.xlane.f32.xlu1 %v1216_v45  ;;  %v2369_v50 = vadd.f32 %v2298_v6, %v1109_v44 }
 0x2bc   : > { %v2364_v47 = vadd.f32 %v1874_v46, %v2298_v6  ;;  %v1112_v48 = vpop.f32.mrb[31].mxu0  ;;  %v1231_v49 = vsel %vm1188_vm1, %v2359_v43, -inf }
 0x2bd   : > { %v2372_v51 = vadd.f32 %v2298_v6, %v1112_v48  ;;  %v1225_v54 = vsel %vm1188_vm1, %v2369_v50, -inf }
 0x2be   : > { %1232 = vmax.xlane.f32.xlu0 %v1231_v49  ;;  %v1234_v52 = vsel %vm1188_vm1, %v2364_v47, -inf }
 0x2bf   : > { %1235 = vmax.xlane.f32.xlu1 %v1234_v52  ;;  %v1228_v57 = vsel %vm1188_vm1, %v2372_v51, -inf }
 0x2c1   : > { %v1877_v53 = vpop.f32.mrb[32].mxu0 }
 0x2c2   : > { %v2379_v55 = vadd.f32 %v1877_v53, %v2298_v6  ;;  %v1125_v56 = vpop.f32.mrb[33].mxu0  ;;  %1226 = vmax.xlane.f32.xlu0 %v1225_v54 }
 0x2c3   : > { %v1878_v58 = vpop.f32.mrb[34].mxu0  ;;  %1229 = vmax.xlane.f32.xlu1 %v1228_v57  ;;  %v2389_v62 = vadd.f32 %v2298_v6, %v1125_v56 }
 0x2c4   : > { %v2384_v59 = vadd.f32 %v1878_v58, %v2298_v6  ;;  %v1128_v60 = vpop.f32.mrb[35].mxu0  ;;  %v1243_v61 = vsel %vm1188_vm1, %v2379_v55, -inf }
 0x2c5   : > { %v2392_v63 = vadd.f32 %v2298_v6, %v1128_v60  ;;  %v1237_v2 = vsel %vm1188_vm1, %v2389_v62, -inf }
 0x2c6   : > { %1244 = vmax.xlane.f32.xlu0 %v1243_v61  ;;  %v1246_v0 = vsel %vm1188_vm1, %v2384_v59, -inf }
 0x2c7   : > { %1247 = vmax.xlane.f32.xlu1 %v1246_v0  ;;  %v1240_v5 = vsel %vm1188_vm1, %v2392_v63, -inf }
 0x2c9   : > { %v1881_v1 = vpop.f32.mrb[36].mxu0 }
 0x2ca   : > { %v2399_v3 = vadd.f32 %v1881_v1, %v2298_v6  ;;  %v1141_v4 = vpop.f32.mrb[37].mxu0  ;;  %1238 = vmax.xlane.f32.xlu0 %v1237_v2 }
 0x2cb   : > { %v1882_v7 = vpop.f32.mrb[38].mxu0  ;;  %1241 = vmax.xlane.f32.xlu1 %v1240_v5  ;;  %v2409_v15 = vadd.f32 %v2298_v6, %v1141_v4 }
 0x2cc   : > { %v2404_v10 = vadd.f32 %v1882_v7, %v2298_v6  ;;  %v1144_v12 = vpop.f32.mrb[39].mxu0  ;;  %v1255_v14 = vsel %vm1188_vm1, %v2399_v3, -inf }
 0x2cd   : > { %v2412_v17 = vadd.f32 %v2298_v6, %v1144_v12  ;;  %v1249_v20 = vsel %vm1188_vm1, %v2409_v15, -inf }
 0x2ce   : > { %1256 = vmax.xlane.f32.xlu0 %v1255_v14  ;;  %v1258_v18 = vsel %vm1188_vm1, %v2404_v10, -inf }
 0x2cf   : > { %1259 = vmax.xlane.f32.xlu1 %v1258_v18  ;;  %v1252_v23 = vsel %vm1188_vm1, %v2412_v17, -inf }
 0x2d1   : > { %v1885_v19 = vpop.f32.mrb[40].mxu0 }
 0x2d2   : > { %v2419_v11 = vadd.f32 %v1885_v19, %v2298_v6  ;;  %v1157_v21 = vpop.f32.mrb[41].mxu0  ;;  %1250 = vmax.xlane.f32.xlu0 %v1249_v20 }
 0x2d3   : > { %v1886_v24 = vpop.f32.mrb[42].mxu0  ;;  %1253 = vmax.xlane.f32.xlu1 %v1252_v23  ;;  %v2429_v31 = vadd.f32 %v2298_v6, %v1157_v21 }
 0x2d4   : > { %v2424_v27 = vadd.f32 %v1886_v24, %v2298_v6  ;;  %v1160_v28 = vpop.f32.mrb[43].mxu0  ;;  %v1267_v29 = vsel %vm1188_vm1, %v2419_v11, -inf }
 0x2d5   : > { %v2432_v33 = vadd.f32 %v2298_v6, %v1160_v28  ;;  %v1261_v37 = vsel %vm1188_vm1, %v2429_v31, -inf }
 0x2d6   : > { %1268 = vmax.xlane.f32.xlu0 %v1267_v29  ;;  %v1270_v34 = vsel %vm1188_vm1, %v2424_v27, -inf }
 0x2d7   : > { %1271 = vmax.xlane.f32.xlu1 %v1270_v34  ;;  %v1264_v41 = vsel %vm1188_vm1, %v2432_v33, -inf }
 0x2d9   : > { %v1889_v36 = vpop.f32.mrb[44].mxu0 }
 0x2da   : > { %v1173_v40 = vpop.f32.mrb[45].mxu0  ;;  %1262 = vmax.xlane.f32.xlu0 %v1261_v37  ;;  %v2444_v46 = vadd.f32 %v1889_v36, %v2298_v6 }
 0x2db   : > { %v2441_v42 = vadd.f32 %v2298_v6, %v1173_v40  ;;  %v1890_v44 = vpop.f32.mrb[46].mxu0  ;;  %1265 = vmax.xlane.f32.xlu1 %v1264_v41 }
 0x2dc   : > { %v1176_v45 = vpop.f32.mrb[47].mxu0  ;;  %v2452_v52 = vadd.f32 %v1890_v44, %v2298_v6  ;;  %v1279_v54 = vsel %vm1188_vm1, %v2444_v46, -inf }
 0x2dd   : > { %v2447_v48 = vadd.f32 %v2298_v6, %v1176_v45  ;;  %v1273_v49 = vsel %vm1188_vm1, %v2441_v42, -inf }
 0x2de   : > { %1274 = vmax.xlane.f32.xlu0 %v1273_v49  ;;  %v1282_v56 = vsel %vm1188_vm1, %v2452_v52, -inf }
 0x2df   : > { %v1276_v53 = vsel %vm1188_vm1, %v2447_v48, -inf }
 0x2e0   : > { %1277 = vmax.xlane.f32.xlu1 %v1276_v53 }
 0x2e2   : > { %1280 = vmax.xlane.f32.xlu0 %v1279_v54 }
 0x2e4   : > { %1283 = vmax.xlane.f32.xlu1 %v1282_v56 }
 0x332   : > { %v1197_v57 = vpop.xlane.xlu1 %1196 }
 0x333   : > { %v1287_v58 = vsub.f32 %v2301_v9, %v1197_v57  ;;  %v1191_v60 = vpop.xlane.xlu0 %1190 }
 0x334   : > { %v1285_v61 = vsub.f32 %v2304_v8, %v1191_v60 }
 0x335   : > { %v1321_v6 = vmul.f32 1.442695, %v1287_v58 }
 0x336   : > { %v1317_v0 = vmul.f32 1.442695, %v1285_v61  ;;  %v1200_v1 = vpop.xlane.xlu1 %1199 }
 0x337   : > { %1937 = vpow2.f32 %v1321_v6  ;;  %v1288_v2 = vsub.f32 %v2307_v13, %v1200_v1  ;;  %v1194_v4 = vpop.xlane.xlu0 %1193 }
 0x338   : > { %v1286_v5 = vsub.f32 %v2312_v16, %v1194_v4  ;;  %1939 = vpow2.f32 %v1317_v0 }
 0x339   : > { %v1323_v7 = vmul.f32 1.442695, %v1288_v2 }
 0x33a   : > { %v1319_v12 = vmul.f32 1.442695, %v1286_v5 }
 0x33b   : > { %1941 = vpow2.f32 %v1323_v7  ;;  %v1209_v14 = vpop.xlane.xlu0 %1208 }
 0x33c   : > { %v1291_v18 = vsub.f32 %v2321_v32, %v1209_v14  ;;  %v1212_v9 = vpop.xlane.xlu1 %1211  ;;  %1943 = vpow2.f32 %v1319_v12 }
 0x33d   : > { %v1292_v8 = vsub.f32 %v2324_v22, %v1212_v9 }
 0x33e   : > { %v1329_v19 = vmul.f32 1.442695, %v1291_v18 }
 0x33f   : > { %v1331_v20 = vmul.f32 1.442695, %v1292_v8  ;;  %v1203_v21 = vpop.xlane.xlu0 %1202 }
 0x340   : > { %1945 = vpow2.f32 %v1329_v19  ;;  %v1289_v13 = vsub.f32 %v2329_v25, %v1203_v21  ;;  %v1206_v23 = vpop.xlane.xlu1 %1205 }
 0x341   : > { %v2467_v24 = vpop.eup %1937  ;;  %1947 = vpow2.f32 %v1331_v20  ;;  %v1290_v16 = vsub.f32 %v2332_v26, %v1206_v23 }
 0x342   : > { %v1325_v28 = vmul.f32 1.442695, %v1289_v13  ;;  %v1387_v32 = vsel %vm1188_vm1, %v2467_v24, 0.0  ;;  %v2472_v29 = vpop.eup %1939 }
 0x343   : > { %v1327_v34 = vmul.f32 1.442695, %v1290_v16  ;;  %1388 = vadd.xlane.f32.xlu0 %v1387_v32  ;;  %v1221_v22 = vpop.xlane.xlu0 %1220  ;;  %v1381_v44 = vsel %vm1188_vm1, %v2472_v29, 0.0 }
 0x344   : > { %1949 = vpow2.f32 %v1325_v28  ;;  %v1295_v36 = vsub.f32 %v2339_v30, %v1221_v22  ;;  %v1224_v37 = vpop.xlane.xlu1 %1223 }
 0x345   : > { %v2475_v25 = vpop.eup %1941  ;;  %1951 = vpow2.f32 %v1327_v34  ;;  %v1296_v40 = vsub.f32 %v2344_v35, %v1224_v37 }
 0x346   : > { %v1337_v41 = vmul.f32 1.442695, %v1295_v36  ;;  %v1390_v26 = vsel %vm1188_vm1, %v2475_v25, 0.0  ;;  %v2482_v45 = vpop.eup %1943 }
 0x347   : > { %v1339_v49 = vmul.f32 1.442695, %v1296_v40  ;;  %1391 = vadd.xlane.f32.xlu1 %v1390_v26  ;;  %1382 = vadd.xlane.f32.xlu0 %v1381_v44  ;;  %v1215_v53 = vpop.xlane.xlu0 %1214  ;;  %v1384_v58 = vsel %vm1188_vm1, %v2482_v45, 0.0 }
 0x348   : > { %1953 = vpow2.f32 %v1337_v41  ;;  %v1293_v30 = vsub.f32 %v2349_v38, %v1215_v53  ;;  %v1218_v54 = vpop.xlane.xlu1 %1217 }
 0x349   : > { %1955 = vpow2.f32 %v1339_v49  ;;  %v1294_v35 = vsub.f32 %v2352_v39, %v1218_v54 }
 0x34a   : > { %v2486_v56 = vpop.eup %1945  ;;  %v1333_v57 = vmul.f32 1.442695, %v1293_v30 }
 0x34b   : > { %v2490_v60 = vpop.eup %1947  ;;  %v1335_v61 = vmul.f32 1.442695, %v1294_v35  ;;  %1385 = vadd.xlane.f32.xlu1 %v1384_v58  ;;  %v1233_v6 = vpop.xlane.xlu0 %1232  ;;  %v1399_v0 = vsel %vm1188_vm1, %v2486_v56, 0.0 }
 0x34c   : > { %1957 = vpow2.f32 %v1333_v57  ;;  %v1299_v38 = vsub.f32 %v2359_v43, %v1233_v6  ;;  %v1236_v1 = vpop.xlane.xlu1 %1235  ;;  %1400 = vadd.xlane.f32.xlu0 %v1399_v0  ;;  %v1402_v5 = vsel %vm1188_vm1, %v2490_v60, 0.0 }
 0x34d   : > { %1959 = vpow2.f32 %v1335_v61  ;;  %v1300_v39 = vsub.f32 %v2364_v47, %v1236_v1 }
 0x34e   : > { %v2496_v2 = vpop.eup %1949  ;;  %v1345_v4 = vmul.f32 1.442695, %v1299_v38 }
 0x34f   : > { %v2500_v7 = vpop.eup %1951  ;;  %v1347_v12 = vmul.f32 1.442695, %v1300_v39  ;;  %1403 = vadd.xlane.f32.xlu1 %v1402_v5  ;;  %v1227_v14 = vpop.xlane.xlu0 %1226  ;;  %v1393_v18 = vsel %vm1188_vm1, %v2496_v2, 0.0 }
 0x350   : > { %1961 = vpow2.f32 %v1345_v4  ;;  %v1297_v43 = vsub.f32 %v2369_v50, %v1227_v14  ;;  %v1230_v9 = vpop.xlane.xlu1 %1229  ;;  %1394 = vadd.xlane.f32.xlu0 %v1393_v18  ;;  %v1396_v20 = vsel %vm1188_vm1, %v2500_v7, 0.0 }
 0x351   : > { %1963 = vpow2.f32 %v1347_v12  ;;  %v1298_v47 = vsub.f32 %v2372_v51, %v1230_v9 }
 0x352   : > { %v2506_v8 = vpop.eup %1953  ;;  %v1341_v19 = vmul.f32 1.442695, %v1297_v43 }
 0x353   : > { %v2510_v21 = vpop.eup %1955  ;;  %v1343_v13 = vmul.f32 1.442695, %v1298_v47  ;;  %1397 = vadd.xlane.f32.xlu1 %v1396_v20  ;;  %v1245_v23 = vpop.xlane.xlu0 %1244  ;;  %v1411_v16 = vsel %vm1188_vm1, %v2506_v8, 0.0 }
 0x354   : > { %1965 = vpow2.f32 %v1341_v19  ;;  %v1303_v50 = vsub.f32 %v2379_v55, %v1245_v23  ;;  %v1248_v28 = vpop.xlane.xlu1 %1247  ;;  %1412 = vadd.xlane.f32.xlu0 %v1411_v16  ;;  %v1414_v22 = vsel %vm1188_vm1, %v2510_v21, 0.0 }
 0x355   : > { %1967 = vpow2.f32 %v1343_v13  ;;  %v1304_v51 = vsub.f32 %v2384_v59, %v1248_v28 }
 0x356   : > { %v2516_v32 = vpop.eup %1957  ;;  %v1353_v34 = vmul.f32 1.442695, %v1303_v50 }
 0x357   : > { %v2520_v36 = vpop.eup %1959  ;;  %v1355_v37 = vmul.f32 1.442695, %v1304_v51  ;;  %1415 = vadd.xlane.f32.xlu1 %v1414_v22  ;;  %v1239_v40 = vpop.xlane.xlu0 %1238  ;;  %v1405_v41 = vsel %vm1188_vm1, %v2516_v32, 0.0 }
 0x358   : > { %1969 = vpow2.f32 %v1353_v34  ;;  %v1301_v55 = vsub.f32 %v2389_v62, %v1239_v40  ;;  %v1242_v26 = vpop.xlane.xlu1 %1241  ;;  %1406 = vadd.xlane.f32.xlu0 %v1405_v41  ;;  %v1408_v53 = vsel %vm1188_vm1, %v2520_v36, 0.0 }
 0x359   : > { %1971 = vpow2.f32 %v1355_v37  ;;  %v1302_v59 = vsub.f32 %v2392_v63, %v1242_v26 }
 0x35a   : > { %v2526_v44 = vpop.eup %1961  ;;  %v1349_v49 = vmul.f32 1.442695, %v1301_v55 }
 0x35b   : > { %v2530_v30 = vpop.eup %1963  ;;  %v1351_v54 = vmul.f32 1.442695, %v1302_v59  ;;  %1409 = vadd.xlane.f32.xlu1 %v1408_v53  ;;  %v1257_v35 = vpop.xlane.xlu0 %1256  ;;  %v1423_v57 = vsel %vm1188_vm1, %v2526_v44, 0.0 }
 0x35c   : > { %1973 = vpow2.f32 %v1349_v49  ;;  %v1307_v62 = vsub.f32 %v2399_v3, %v1257_v35  ;;  %v1260_v58 = vpop.xlane.xlu1 %1259  ;;  %1424 = vadd.xlane.f32.xlu0 %v1423_v57  ;;  %v1426_v0 = vsel %vm1188_vm1, %v2530_v30, 0.0 }
 0x35d   : > { %1975 = vpow2.f32 %v1351_v54  ;;  %v1308_v63 = vsub.f32 %v2404_v10, %v1260_v58 }
 0x35e   : > { %v2536_v61 = vpop.eup %1965  ;;  %v1361_v6 = vmul.f32 1.442695, %v1307_v62 }
 0x35f   : > { %v2540_v38 = vpop.eup %1967  ;;  %v1363_v1 = vmul.f32 1.442695, %v1308_v63  ;;  %1427 = vadd.xlane.f32.xlu1 %v1426_v0  ;;  %v1251_v39 = vpop.xlane.xlu0 %1250  ;;  %v1417_v4 = vsel %vm1188_vm1, %v2536_v61, 0.0 }
 0x360   : > { %1977 = vpow2.f32 %v1361_v6  ;;  %v1305_v3 = vsub.f32 %v2409_v15, %v1251_v39  ;;  %v1254_v5 = vpop.xlane.xlu1 %1253  ;;  %1418 = vadd.xlane.f32.xlu0 %v1417_v4  ;;  %v1420_v18 = vsel %vm1188_vm1, %v2540_v38, 0.0 }
 0x361   : > { %1979 = vpow2.f32 %v1363_v1  ;;  %v1306_v10 = vsub.f32 %v2412_v17, %v1254_v5 }
 0x362   : > { %v2546_v12 = vpop.eup %1969  ;;  %v1357_v14 = vmul.f32 1.442695, %v1305_v3 }
 0x363   : > { %v2550_v43 = vpop.eup %1971  ;;  %v1359_v9 = vmul.f32 1.442695, %v1306_v10  ;;  %1421 = vadd.xlane.f32.xlu1 %v1420_v18  ;;  %v1269_v47 = vpop.xlane.xlu0 %1268  ;;  %v1435_v19 = vsel %vm1188_vm1, %v2546_v12, 0.0 }
 0x364   : > { %1981 = vpow2.f32 %v1357_v14  ;;  %v1311_v15 = vsub.f32 %v2419_v11, %v1269_v47  ;;  %v1272_v20 = vpop.xlane.xlu1 %1271  ;;  %1436 = vadd.xlane.f32.xlu0 %v1435_v19  ;;  %v1438_v16 = vsel %vm1188_vm1, %v2550_v43, 0.0 }
 0x365   : > { %1983 = vpow2.f32 %v1359_v9  ;;  %v1312_v17 = vsub.f32 %v2424_v27, %v1272_v20 }
 0x366   : > { %v2556_v13 = vpop.eup %1973  ;;  %v1369_v23 = vmul.f32 1.442695, %v1311_v15 }
 0x367   : > { %v2560_v50 = vpop.eup %1975  ;;  %v1371_v28 = vmul.f32 1.442695, %v1312_v17  ;;  %1439 = vadd.xlane.f32.xlu1 %v1438_v16  ;;  %v1263_v51 = vpop.xlane.xlu0 %1262  ;;  %v1429_v34 = vsel %vm1188_vm1, %v2556_v13, 0.0 }
 0x368   : > { %1985 = vpow2.f32 %v1369_v23  ;;  %v1309_v11 = vsub.f32 %v2429_v31, %v1263_v51  ;;  %v1266_v22 = vpop.xlane.xlu1 %1265  ;;  %1430 = vadd.xlane.f32.xlu0 %v1429_v34  ;;  %v1432_v41 = vsel %vm1188_vm1, %v2560_v50, 0.0 }
 0x369   : > { %1987 = vpow2.f32 %v1371_v28  ;;  %v1310_v27 = vsub.f32 %v2432_v33, %v1266_v22 }
 0x36a   : > { %v2566_v37 = vpop.eup %1977  ;;  %v1365_v40 = vmul.f32 1.442695, %v1309_v11 }
 0x36b   : > { %v2570_v55 = vpop.eup %1979  ;;  %v1367_v26 = vmul.f32 1.442695, %v1310_v27  ;;  %1433 = vadd.xlane.f32.xlu1 %v1432_v41  ;;  %v1275_v59 = vpop.xlane.xlu0 %1274  ;;  %v1447_v49 = vsel %vm1188_vm1, %v2566_v37, 0.0 }
 0x36c   : > { %1989 = vpow2.f32 %v1365_v40  ;;  %v1313_v31 = vsub.f32 %v2441_v42, %v1275_v59  ;;  %1448 = vadd.xlane.f32.xlu0 %v1447_v49  ;;  %v1450_v57 = vsel %vm1188_vm1, %v2570_v55, 0.0 }
 0x36d   : > { %1991 = vpow2.f32 %v1367_v26  ;;  %v1278_v33 = vpop.xlane.xlu1 %1277 }
 0x36e   : > { %v2575_v53 = vpop.eup %1981  ;;  %v1373_v54 = vmul.f32 1.442695, %v1313_v31  ;;  %v1314_v35 = vsub.f32 %v2447_v48, %v1278_v33 }
 0x36f   : > { %v2580_v62 = vpop.eup %1983  ;;  %1451 = vadd.xlane.f32.xlu1 %v1450_v57  ;;  %v1281_v58 = vpop.xlane.xlu0 %1280  ;;  %v1441_v63 = vsel %vm1188_vm1, %v2575_v53, 0.0 }
 0x370   : > { %1993 = vpow2.f32 %v1373_v54  ;;  %v1375_v42 = vmul.f32 1.442695, %v1314_v35  ;;  %v1315_v6 = vsub.f32 %v2444_v46, %v1281_v58  ;;  %1442 = vadd.xlane.f32.xlu0 %v1441_v63  ;;  %v1444_v4 = vsel %vm1188_vm1, %v2580_v62, 0.0 }
 0x371   : > { %v1284_v0 = vpop.xlane.xlu1 %1283 }
 0x372   : > { %v2585_v1 = vpop.eup %1985  ;;  %1995 = vpow2.f32 %v1375_v42  ;;  %v1377_v48 = vmul.f32 1.442695, %v1315_v6  ;;  %v1316_v39 = vsub.f32 %v2452_v52, %v1284_v0 }
 0x373   : > { %v2590_v3 = vpop.eup %1987  ;;  %1445 = vadd.xlane.f32.xlu1 %v1444_v4  ;;  %v1459_v5 = vsel %vm1188_vm1, %v2585_v1, 0.0 }
 0x374   : > { %1997 = vpow2.f32 %v1377_v48  ;;  %v1379_v10 = vmul.f32 1.442695, %v1316_v39  ;;  %1460 = vadd.xlane.f32.xlu0 %v1459_v5  ;;  %v1462_v14 = vsel %vm1188_vm1, %v2590_v3, 0.0 }
 0x376   : > { %v2594_v46 = vpop.eup %1989  ;;  %1999 = vpow2.f32 %v1379_v10 }
 0x377   : > { %v2598_v18 = vpop.eup %1991  ;;  %1463 = vadd.xlane.f32.xlu1 %v1462_v14  ;;  %v1453_v52 = vsel %vm1188_vm1, %v2594_v46, 0.0 }
 0x378   : > { %1454 = vadd.xlane.f32.xlu0 %v1453_v52  ;;  %v1456_v47 = vsel %vm1188_vm1, %v2598_v18, 0.0 }
 0x37a   : > { %v2602_v9 = vpop.eup %1993 }
 0x37b   : > { %1457 = vadd.xlane.f32.xlu1 %v1456_v47  ;;  %v1465_v19 = vsel %vm1188_vm1, %v2602_v9, 0.0 }
 0x37c   : > { %v2608_v15 = vpop.eup %1995  ;;  %1466 = vadd.xlane.f32.xlu0 %v1465_v19 }
 0x37d   : > { %v1468_v20 = vsel %vm1188_vm1, %v2608_v15, 0.0 }
 0x37e   : > { %v2612_v17 = vpop.eup %1997 }
 0x37f   : > { %1469 = vadd.xlane.f32.xlu1 %v1468_v20  ;;  %v1471_v23 = vsel %vm1188_vm1, %v2612_v17, 0.0 }
 0x380   : > { %v2616_v16 = vpop.eup %1999  ;;  %1472 = vadd.xlane.f32.xlu0 %v1471_v23 }
 0x381   : > { %v1474_v28 = vsel %vm1188_vm1, %v2616_v16, 0.0 }
 0x383   : > { %1475 = vadd.xlane.f32.xlu1 %v1474_v28 }
 0x3d0   : > { %v1389_v51 = vpop.xlane.xlu0 %1388 }
 0x3d1   : > { %2001 = vrcp.f32 %v1389_v51 }
 0x3d4   : > { %v1392_v34 = vpop.xlane.xlu1 %1391  ;;  %v1383_v11 = vpop.xlane.xlu0 %1382 }
 0x3d5   : > { %2003 = vrcp.f32 %v1392_v34 }
 0x3d6   : > { %2005 = vrcp.f32 %v1383_v11 }
 0x3d8   : > { %v1386_v22 = vpop.xlane.xlu1 %1385 }
 0x3d9   : > { %2007 = vrcp.f32 %v1386_v22  ;;  %v1401_v27 = vpop.xlane.xlu0 %1400 }
 0x3da   : > { %2009 = vrcp.f32 %v1401_v27 }
 0x3db   : > { %v2002_v40 = vpop.eup %2001 }
 0x3dc   : > { %v1482_v41 = vmul.f32 %v2002_v40, %v2467_v24  ;;  %v1404_v26 = vpop.xlane.xlu1 %1403 }
 0x3dd   : > { %2011 = vrcp.f32 %v1404_v26  ;;  %v1395_v59 = vpop.xlane.xlu0 %1394 }
 0x3de   : > { %1543 = vst.msk [vmem:[%s2624_s11 + $0x10] sm:$0xff] %vm1188_vm1, %v1482_v41  ;;  %2013 = vrcp.f32 %v1395_v59 }
 0x3df   : > { %v2004_v49 = vpop.eup %2003 }
 0x3e0   : > { %v2006_v31 = vpop.eup %2005  ;;  %v1484_v33 = vmul.f32 %v2004_v49, %v2475_v25  ;;  %v1398_v54 = vpop.xlane.xlu1 %1397 }
 0x3e1   : > { %v1478_v35 = vmul.f32 %v2006_v31, %v2472_v29  ;;  %2015 = vrcp.f32 %v1398_v54  ;;  %v1413_v57 = vpop.xlane.xlu0 %1412 }
 0x3e2   : > { %1544 = vst.msk [vmem:[%s2624_s11 + $0x18] sm:$0xff] %vm1188_vm1, %v1484_v33  ;;  %2017 = vrcp.f32 %v1413_v57 }
 0x3e3   : > { %v2008_v24 = vpop.eup %2007  ;;  %1541 = vst.msk [vmem:[%s2624_s11] sm:$0xff] %vm1188_vm1, %v1478_v35 }
 0x3e4   : > { %v2010_v58 = vpop.eup %2009  ;;  %v1480_v63 = vmul.f32 %v2008_v24, %v2482_v45  ;;  %v1416_v42 = vpop.xlane.xlu1 %1415 }
 0x3e5   : > { %v1490_v6 = vmul.f32 %v2010_v58, %v2486_v56  ;;  %2019 = vrcp.f32 %v1416_v42  ;;  %v1407_v25 = vpop.xlane.xlu0 %1406 }
 0x3e6   : > { %1542 = vst.msk [vmem:[%s2624_s11 + $0x8] sm:$0xff] %vm1188_vm1, %v1480_v63  ;;  %2021 = vrcp.f32 %v1407_v25 }
 0x3e7   : > { %v2012_v29 = vpop.eup %2011  ;;  %1547 = vst.msk [vmem:[%s2624_s11 + $0x30] sm:$0xff] %vm1188_vm1, %v1490_v6 }
 0x3e8   : > { %v2014_v0 = vpop.eup %2013  ;;  %v1492_v48 = vmul.f32 %v2012_v29, %v2490_v60  ;;  %v1410_v39 = vpop.xlane.xlu1 %1409 }
 0x3e9   : > { %v1486_v4 = vmul.f32 %v2014_v0, %v2496_v2  ;;  %2023 = vrcp.f32 %v1410_v39  ;;  %v1425_v45 = vpop.xlane.xlu0 %1424 }
 0x3ea   : > { %1548 = vst.msk [vmem:[%s2624_s11 + $0x38] sm:$0xff] %vm1188_vm1, %v1492_v48  ;;  %2025 = vrcp.f32 %v1425_v45 }
 0x3eb   : > { %v2016_v56 = vpop.eup %2015  ;;  %1545 = vst.msk [vmem:[%s2624_s11 + $0x20] sm:$0xff] %vm1188_vm1, %v1486_v4 }
 0x3ec   : > { %v2018_v5 = vpop.eup %2017  ;;  %v1488_v10 = vmul.f32 %v2016_v56, %v2500_v7  ;;  %v1428_v14 = vpop.xlane.xlu1 %1427 }
 0x3ed   : > { %v1498_v52 = vmul.f32 %v2018_v5, %v2506_v8  ;;  %2027 = vrcp.f32 %v1428_v14  ;;  %v1419_v60 = vpop.xlane.xlu0 %1418 }
 0x3ee   : > { %1546 = vst.msk [vmem:[%s2624_s11 + $0x28] sm:$0xff] %vm1188_vm1, %v1488_v10  ;;  %2029 = vrcp.f32 %v1419_v60 }
 0x3ef   : > { %v2020_v2 = vpop.eup %2019  ;;  %1551 = vst.msk [vmem:[%s2624_s11 + $0x50] sm:$0xff] %vm1188_vm1, %v1498_v52 }
 0x3f0   : > { %v2022_v47 = vpop.eup %2021  ;;  %v1500_v19 = vmul.f32 %v2020_v2, %v2510_v21  ;;  %v1422_v20 = vpop.xlane.xlu1 %1421 }
 0x3f1   : > { %v1494_v23 = vmul.f32 %v2022_v47, %v2516_v32  ;;  %2031 = vrcp.f32 %v1422_v20  ;;  %v1437_v7 = vpop.xlane.xlu0 %1436 }
 0x3f2   : > { %1552 = vst.msk [vmem:[%s2624_s11 + $0x58] sm:$0xff] %vm1188_vm1, %v1500_v19  ;;  %2033 = vrcp.f32 %v1437_v7 }
 0x3f3   : > { %v2024_v8 = vpop.eup %2023  ;;  %1549 = vst.msk [vmem:[%s2624_s11 + $0x40] sm:$0xff] %vm1188_vm1, %v1494_v23 }
 0x3f4   : > { %v2026_v28 = vpop.eup %2025  ;;  %v1496_v51 = vmul.f32 %v2024_v8, %v2520_v36  ;;  %v1440_v34 = vpop.xlane.xlu1 %1439 }
 0x3f5   : > { %v1506_v11 = vmul.f32 %v2026_v28, %v2526_v44  ;;  %2035 = vrcp.f32 %v1440_v34  ;;  %v1431_v21 = vpop.xlane.xlu0 %1430 }
 0x3f6   : > { %1550 = vst.msk [vmem:[%s2624_s11 + $0x48] sm:$0xff] %vm1188_vm1, %v1496_v51  ;;  %2037 = vrcp.f32 %v1431_v21 }
 0x3f7   : > { %v2028_v32 = vpop.eup %2027  ;;  %1555 = vst.msk [vmem:[%s2624_s11 + $0x70] sm:$0xff] %vm1188_vm1, %v1506_v11 }
 0x3f8   : > { %v2030_v22 = vpop.eup %2029  ;;  %v1508_v27 = vmul.f32 %v2028_v32, %v2530_v30  ;;  %v1434_v40 = vpop.xlane.xlu1 %1433 }
 0x3f9   : > { %v1502_v41 = vmul.f32 %v2030_v22, %v2536_v61  ;;  %2039 = vrcp.f32 %v1434_v40  ;;  %v1449_v36 = vpop.xlane.xlu0 %1448 }
 0x3fa   : > { %1556 = vst.msk [vmem:[%s2624_s11 + $0x78] sm:$0xff] %vm1188_vm1, %v1508_v27  ;;  %2041 = vrcp.f32 %v1449_v36 }
 0x3fb   : > { %v2032_v44 = vpop.eup %2031  ;;  %1553 = vst.msk [vmem:[%s2624_s11 + $0x60] sm:$0xff] %vm1188_vm1, %v1502_v41 }
 0x3fc   : > { %v2034_v26 = vpop.eup %2033  ;;  %v1504_v59 = vmul.f32 %v2032_v44, %v2540_v38  ;;  %v1452_v49 = vpop.xlane.xlu1 %1451 }
 0x3fd   : > { %v1514_v31 = vmul.f32 %v2034_v26, %v2546_v12  ;;  %2043 = vrcp.f32 %v1452_v49  ;;  %v1443_v30 = vpop.xlane.xlu0 %1442 }
 0x3fe   : > { %1554 = vst.msk [vmem:[%s2624_s11 + $0x68] sm:$0xff] %vm1188_vm1, %v1504_v59  ;;  %2045 = vrcp.f32 %v1443_v30 }
 0x3ff   : > { %v2036_v61 = vpop.eup %2035  ;;  %1559 = vst.msk [vmem:[%s2624_s11 + $0x90] sm:$0xff] %vm1188_vm1, %v1514_v31 }
 0x400   : > { %v2038_v33 = vpop.eup %2037  ;;  %v1516_v54 = vmul.f32 %v2036_v61, %v2550_v43  ;;  %v1446_v35 = vpop.xlane.xlu1 %1445 }
 0x401   : > { %v1510_v57 = vmul.f32 %v2038_v33, %v2556_v13  ;;  %2047 = vrcp.f32 %v1446_v35  ;;  %v1461_v38 = vpop.xlane.xlu0 %1460 }
 0x402   : > { %1560 = vst.msk [vmem:[%s2624_s11 + $0x98] sm:$0xff] %vm1188_vm1, %v1516_v54  ;;  %2049 = vrcp.f32 %v1461_v38 }
 0x403   : > { %v2040_v12 = vpop.eup %2039  ;;  %1557 = vst.msk [vmem:[%s2624_s11 + $0x80] sm:$0xff] %vm1188_vm1, %v1510_v57 }
 0x404   : > { %v2042_v24 = vpop.eup %2041  ;;  %v1512_v58 = vmul.f32 %v2040_v12, %v2560_v50  ;;  %v1464_v63 = vpop.xlane.xlu1 %1463 }
 0x405   : > { %v1522_v42 = vmul.f32 %v2042_v24, %v2566_v37  ;;  %2051 = vrcp.f32 %v1464_v63  ;;  %v1455_v43 = vpop.xlane.xlu0 %1454 }
 0x406   : > { %1558 = vst.msk [vmem:[%s2624_s11 + $0x88] sm:$0xff] %vm1188_vm1, %v1512_v58  ;;  %2053 = vrcp.f32 %v1455_v43 }
 0x407   : > { %v2044_v13 = vpop.eup %2043  ;;  %1563 = vst.msk [vmem:[%s2624_s11 + $0xb0] sm:$0xff] %vm1188_vm1, %v1522_v42 }
 0x408   : > { %v2046_v6 = vpop.eup %2045  ;;  %v1524_v25 = vmul.f32 %v2044_v13, %v2570_v55  ;;  %v1458_v29 = vpop.xlane.xlu1 %1457 }
 0x409   : > { %v1518_v0 = vmul.f32 %v2046_v6, %v2575_v53  ;;  %2055 = vrcp.f32 %v1458_v29  ;;  %v1467_v50 = vpop.xlane.xlu0 %1466 }
 0x40a   : > { %1564 = vst.msk [vmem:[%s2624_s11 + $0xb8] sm:$0xff] %vm1188_vm1, %v1524_v25  ;;  %2057 = vrcp.f32 %v1467_v50 }
 0x40b   : > { %v2048_v37 = vpop.eup %2047  ;;  %1561 = vst.msk [vmem:[%s2624_s11 + $0xa0] sm:$0xff] %vm1188_vm1, %v1518_v0 }
 0x40c   : > { %v2050_v48 = vpop.eup %2049  ;;  %v1520_v39 = vmul.f32 %v2048_v37, %v2580_v62  ;;  %v1470_v4 = vpop.xlane.xlu1 %1469 }
 0x40d   : > { %v1530_v55 = vmul.f32 %v2050_v48, %v2585_v1  ;;  %2059 = vrcp.f32 %v1470_v4  ;;  %v1473_v45 = vpop.xlane.xlu0 %1472 }
 0x40e   : > { %1562 = vst.msk [vmem:[%s2624_s11 + $0xa8] sm:$0xff] %vm1188_vm1, %v1520_v39  ;;  %2061 = vrcp.f32 %v1473_v45 }
 0x40f   : > { %v2052_v53 = vpop.eup %2051  ;;  %1567 = vst.msk [vmem:[%s2624_s11 + $0xd0] sm:$0xff] %vm1188_vm1, %v1530_v55 }
 0x410   : > { %v2054_v56 = vpop.eup %2053  ;;  %v1532_v5 = vmul.f32 %v2052_v53, %v2590_v3  ;;  %v1476_v10 = vpop.xlane.xlu1 %1475 }
 0x411   : > { %v1526_v62 = vmul.f32 %v2054_v56, %v2594_v46  ;;  %2063 = vrcp.f32 %v1476_v10 }
 0x412   : > { %1568 = vst.msk [vmem:[%s2624_s11 + $0xd8] sm:$0xff] %vm1188_vm1, %v1532_v5 }
 0x413   : > { %v2056_v1 = vpop.eup %2055  ;;  %1565 = vst.msk [vmem:[%s2624_s11 + $0xc0] sm:$0xff] %vm1188_vm1, %v1526_v62 }
 0x414   : > { %v2058_v14 = vpop.eup %2057  ;;  %v1528_v52 = vmul.f32 %v2056_v1, %v2598_v18 }
 0x415   : > { %v1534_v60 = vmul.f32 %v2058_v14, %v2602_v9 }
 0x416   : > { %1566 = vst.msk [vmem:[%s2624_s11 + $0xc8] sm:$0xff] %vm1188_vm1, %v1528_v52 }
 0x417   : > { %v2060_v3 = vpop.eup %2059  ;;  %1569 = vst.msk [vmem:[%s2624_s11 + $0xe0] sm:$0xff] %vm1188_vm1, %v1534_v60 }
 0x418   : > { %v2062_v2 = vpop.eup %2061  ;;  %v1536_v46 = vmul.f32 %v2060_v3, %v2608_v15 }
 0x419   : > { %v1538_v47 = vmul.f32 %v2062_v2, %v2612_v17 }
 0x41a   : > { %1570 = vst.msk [vmem:[%s2624_s11 + $0xe8] sm:$0xff] %vm1188_vm1, %v1536_v46 }
 0x41b   : > { %v2064_v19 = vpop.eup %2063  ;;  %1571 = vst.msk [vmem:[%s2624_s11 + $0xf0] sm:$0xff] %vm1188_vm1, %v1538_v47 }
 0x41c   : > { %v1540_v20 = vmul.f32 %v2064_v19, %v2616_v16 }
 0x41e   : > { %1572 = vst.msk [vmem:[%s2624_s11 + $0xf8] sm:$0xff] %vm1188_vm1, %v1540_v20 }
 0x41f PF: > { %s17_s24 = sadd.s32 1, %s2071_s24  }
 0x420   : > { %p14_p4 = scmp.ge.s32.totalorder %s17_s24, 4  }
 0x422   :  { %16 = sbr.rel (!%p14_p4) target bundleno = 1 (0x1), region = 78 }

</bundles_post_ra>
